<compile_context>
chip_gen: v7x
topology: tpu7x:2x2x1
jax: 0.10.0
libtpu: 0.0.40
codegen_flags: <defaults>
</compile_context>

<pallas_src>
from typing import NamedTuple

import jax
import jax.numpy as jnp
from jax.experimental import pallas as pl
from jax.experimental.pallas import tpu as pltpu


_SUBLANE = 16  # bf16 packs 16 rows per sublane tile (also a multiple of the f32 8)


def _round_up(x: int, m: int) -> int:
    return ((x + m - 1) // m) * m


def _vmem_capacity_bytes() -> int:
    try:
        return int(pltpu.get_tpu_info().vmem_capacity_bytes)
    except Exception:
        return 64 * 1024 * 1024  # conservative fallback (v7x per-TensorCore VMEM)


# --------------------------------------------------------------------------------------
# Kernel
# --------------------------------------------------------------------------------------
def _dense_stack_kernel(x_ref, *refs):
    """Fused forward pass for the whole DenseStack on one batch tile.

    refs = (w0, b0, w1, b1, ..., w_{L-1}, b_{L-1}, out_ref)
      w_i: (k_i, n_i)  compute dtype (bf16), pre-transposed + lane-padded in the packer
      b_i: (1, n_i)    f32 (bias-add happens on the f32 accumulator)
    """
    out_ref = refs[-1]
    params = refs[:-1]
    n_layers = len(params) // 2

    h = x_ref[...]                                   # (TILE_B, in_width), bf16
    for i in range(n_layers):
        w = params[2 * i][...]                       # (k, n_pad) bf16
        b = params[2 * i + 1][...]                   # (1, n_pad) f32
        acc = jnp.dot(h, w, preferred_element_type=jnp.float32)   # MXU bf16, f32 acc
        acc = jnp.maximum(acc + b, 0.0)                            # VPU, f32
        if i + 1 < n_layers:
            h = acc.astype(w.dtype)                  # back to bf16 for the next matmul
        else:
            out_ref[...] = acc.astype(out_ref.dtype)


# --------------------------------------------------------------------------------------
# One-time parameter packing (hoisted out of the forward call)
# --------------------------------------------------------------------------------------
class PackedDenseStack(NamedTuple):
    params: tuple      # (w0, b0, w1, b1, ...)
    in_width: int
    out_width: int
    out_pad: int


def pack_dense_stack_params(weights, biases, *, compute_dtype=jnp.bfloat16):
    """Pack params ONCE (at init): transpose to (in, out), zero-pad every output dim to
    a multiple of 128 lanes, cast weights to the compute dtype (bf16), biases to f32.
    Layer 0 keeps its natural K dim so the input can be fed unpadded.

    NoisyDense support: fold effective weights (mu + sigma * eps) into `weights` /
    `biases` before calling this; the kernel itself is unchanged.
    """
    assert len(weights) == len(biases) and len(weights) > 0
    in_width = weights[0].shape[1]
    flat = []
    cur_k = in_width
    out_pad = _round_up(weights[-1].shape[0], 128)
    for w, b in zip(weights, biases):
        out_w, k_w = w.shape
        n_pad = _round_up(out_w, 128)
        w_t = jnp.zeros((cur_k, n_pad), dtype=compute_dtype)
        w_t = w_t.at[:k_w, :out_w].set(w.T.astype(compute_dtype))
        b_p = jnp.zeros((1, n_pad), dtype=jnp.float32)
        b_p = b_p.at[:, :out_w].set(b.reshape(1, -1).astype(jnp.float32))
        flat += [w_t, b_p]
        cur_k = n_pad          # next layer consumes the lane-padded activation width
    return PackedDenseStack(params=tuple(flat), in_width=in_width,
                            out_width=weights[-1].shape[0], out_pad=out_pad)


# --------------------------------------------------------------------------------------
# Forward wrapper
# --------------------------------------------------------------------------------------
def _select_tile_b(batch, bytes_per_row, resident_bytes, vmem_budget_bytes):
    b_aligned = _round_up(batch, _SUBLANE)
    avail = max(vmem_budget_bytes - resident_bytes, _SUBLANE * bytes_per_row)
    max_rows = max(_SUBLANE, (avail // bytes_per_row) // _SUBLANE * _SUBLANE)
    tile = min(1024, b_aligned, max_rows)
    # Prefer >=2 grid steps so v7x's second TensorCore gets work (no-op for tiny B).
    if tile >= b_aligned and b_aligned > _SUBLANE:
        tile = _round_up((b_aligned + 1) // 2, _SUBLANE)
    return tile


def dense_stack_forward(x, packed: PackedDenseStack, *, tile_b: int | None = None,
                        out_dtype=None):
    """x: (B, in_width).  `packed` comes from pack_dense_stack_params (done once)."""
    B, in_width = x.shape
    assert in_width == packed.in_width
    compute_dtype = packed.params[0].dtype
    out_dtype = x.dtype if out_dtype is None else out_dtype
    out_pad = packed.out_pad

    # ---- VMEM budgeting (v5e/v6e: 128 MiB; v7x: 64 MiB per TensorCore) ----
    vmem_cap = _vmem_capacity_bytes()
    param_bytes = sum(int(p.size) * jnp.dtype(p.dtype).itemsize for p in packed.params)
    # Constant-index_map blocks are still allocated with 2 pipeline buffers; budget it.
    resident_bytes = 2 * param_bytes
    max_pad = max(p.shape[1] for p in packed.params[::2])
    act_isz = jnp.dtype(compute_dtype).itemsize
    out_isz = jnp.dtype(out_dtype).itemsize
    bytes_per_row = (2 * act_isz * in_width            # double-buffered input tile
                     + 2 * out_isz * out_pad           # double-buffered output tile
                     + 2 * (4 + act_isz) * max_pad)    # live f32 acc + bf16 act (headroom)

    if tile_b is None:
        tile_b = _select_tile_b(B, bytes_per_row, resident_bytes, int(0.6 * vmem_cap))
    tile_b = _round_up(tile_b, _SUBLANE)
    B_pad = _round_up(B, tile_b)

    # Only the batch dim is padded in HBM; the feature dim stays at its natural width.
    x_p = jnp.pad(x.astype(compute_dtype), ((0, B_pad - B), (0, 0)))

    grid = (B_pad // tile_b,)
    x_spec = pl.BlockSpec((tile_b, in_width), lambda i: (i, 0))
    param_specs = [pl.BlockSpec(p.shape, lambda i: (0, 0)) for p in packed.params]
    out_spec = pl.BlockSpec((tile_b, out_pad), lambda i: (i, 0))

    vmem_limit = int(min(vmem_cap,
                         max(resident_bytes + 2 * tile_b * bytes_per_row, 32 << 20)))

    out_p = pl.pallas_call(
        _dense_stack_kernel,
        out_shape=jax.ShapeDtypeStruct((B_pad, out_pad), out_dtype),
        grid=grid,
        in_specs=[x_spec] + param_specs,
        out_specs=out_spec,
        compiler_params=pltpu.CompilerParams(
            dimension_semantics=("parallel",),   # batch tiles are independent
            vmem_limit_bytes=vmem_limit,
        ),
    )(x_p, *packed.params)

    # Slice away batch / lane padding (fuses into the consumer under jit).
    return out_p[:B, :packed.out_width]


# --------------------------------------------------------------------------------------
# Init + references + self-test
# --------------------------------------------------------------------------------------
def init_dense_stack_params(key, initial_width, widths, dtype=jnp.float32):
    """Deterministic init mimicking nn.Linear defaults: U(-1/sqrt(in), 1/sqrt(in))."""
    weights, biases = [], []
    in_w = initial_width
    for out_w in widths:
        key, kw, kb = jax.random.split(key, 3)
        bound = 1.0 / (in_w ** 0.5)
        weights.append(jax.random.uniform(kw, (out_w, in_w), dtype=dtype,
                                          minval=-bound, maxval=bound))
        biases.append(jax.random.uniform(kb, (out_w,), dtype=dtype,
                                         minval=-bound, maxval=bound))
        in_w = out_w
    return weights, biases


def reference_forward_f32(x, weights, biases):
    h = x.astype(jnp.float32)
    for w, b in zip(weights, biases):
        h = jnp.maximum(h @ w.T.astype(jnp.float32) + b.astype(jnp.float32), 0.0)
    return h


def reference_forward_matched(x, weights, biases, compute_dtype=jnp.bfloat16):
    """Same math as the kernel: bf16 operands, f32 accumulate, f32 bias-add/ReLU."""
    h = x.astype(compute_dtype)
    out = None
    for w, b in zip(weights, biases):
        acc = jnp.dot(h, w.T.astype(compute_dtype), preferred_element_type=jnp.float32)
        out = jnp.maximum(acc + b.astype(jnp.float32), 0.0)
        h = out.astype(compute_dtype)
    return out


if __name__ == "__main__":
    # Small shapes consistent with DenseStack(initial_width=32, widths=[64, 48, 16])
    key = jax.random.PRNGKey(0)
    key, kx = jax.random.split(key)

    batch = 2
    initial_width = 32
    widths = [64, 48, 16]

    x = jax.random.normal(kx, (batch, initial_width), dtype=jnp.float32)
    weights, biases = init_dense_stack_params(key, initial_width, widths)

    packed = pack_dense_stack_params(weights, biases)      # hoisted: done once at init
    out = jax.block_until_ready(dense_stack_forward(x, packed))

    assert out.shape == (batch, widths[-1]), out.shape
    ref_bf16 = reference_forward_matched(x, weights, biases)
    ref_f32 = reference_forward_f32(x, weights, biases)
    assert jnp.allclose(out.astype(jnp.float32), ref_bf16, atol=2e-3, rtol=2e-3), \
        "mismatch vs bf16-matched reference"
    assert jnp.allclose(out.astype(jnp.float32), ref_f32, atol=5e-2, rtol=5e-2), \
        "mismatch vs f32 reference"

    # TODO(synk): NoisyDense (noisy_sigma != 0) noise resampling (torch.randn buffers)
    # is host-side state; fold mu + sigma*eps into the weights before packing instead.

    print("KERNEL_OK")
</pallas_src>

<mosaic_0001>
module attributes {stable_mosaic.version = 11 : i64} {
  func.func @_dense_stack_kernel(%arg0: i32, %arg1: memref<16x32xbf16, #tpu.memory_space<vmem>>, %arg2: memref<32x128xbf16, #tpu.memory_space<vmem>>, %arg3: memref<1x128xf32, #tpu.memory_space<vmem>>, %arg4: memref<128x128xbf16, #tpu.memory_space<vmem>>, %arg5: memref<1x128xf32, #tpu.memory_space<vmem>>, %arg6: memref<128x128xbf16, #tpu.memory_space<vmem>>, %arg7: memref<1x128xf32, #tpu.memory_space<vmem>>, %arg8: memref<16x128xf32, #tpu.memory_space<vmem>>) attributes {dimension_semantics = [#tpu.dimension_semantics<parallel>], iteration_bounds = array<i64: 1>, scalar_prefetch = 0 : i64, scratch_operands = 0 : i64, tpu.core_type = #tpu.core_type<tc>, window_params = [{transform_indices = @transform_0, window_bounds = array<i64: 16, 32>}, {pipeline_mode = #tpu.pipeline_mode<synchronous>, transform_indices = @transform_1, window_bounds = array<i64: 32, 128>}, {pipeline_mode = #tpu.pipeline_mode<synchronous>, transform_indices = @transform_2, window_bounds = array<i64: 1, 128>}, {pipeline_mode = #tpu.pipeline_mode<synchronous>, transform_indices = @transform_3, window_bounds = array<i64: 128, 128>}, {pipeline_mode = #tpu.pipeline_mode<synchronous>, transform_indices = @transform_4, window_bounds = array<i64: 1, 128>}, {pipeline_mode = #tpu.pipeline_mode<synchronous>, transform_indices = @transform_5, window_bounds = array<i64: 128, 128>}, {pipeline_mode = #tpu.pipeline_mode<synchronous>, transform_indices = @transform_6, window_bounds = array<i64: 1, 128>}, {transform_indices = @transform_7, window_bounds = array<i64: 16, 128>}]} {
    %c0 = arith.constant 0 : index
    %c0_0 = arith.constant 0 : index
    %0 = vector.load %arg1[%c0, %c0_0] : memref<16x32xbf16, #tpu.memory_space<vmem>>, vector<16x32xbf16>
    %c0_1 = arith.constant 0 : index
    %c0_2 = arith.constant 0 : index
    %1 = vector.load %arg2[%c0_1, %c0_2] : memref<32x128xbf16, #tpu.memory_space<vmem>>, vector<32x128xbf16>
    %c0_3 = arith.constant 0 : index
    %c0_4 = arith.constant 0 : index
    %2 = vector.load %arg3[%c0_3, %c0_4] : memref<1x128xf32, #tpu.memory_space<vmem>>, vector<1x128xf32>
    %cst = arith.constant dense<0.000000e+00> : vector<16x128xf32>
    %3 = tpu.matmul %0, %1, %cst {dimension_numbers = #tpu.dot_dimension_numbers<[1], [0], [0], [1], [0, 0, 1, 1], [], []>} : vector<16x32xbf16>, vector<32x128xbf16>, vector<16x128xf32> -> vector<16x128xf32>
    %4 = vector.broadcast %2 : vector<1x128xf32> to vector<16x128xf32>
    %5 = arith.addf %3, %4 : vector<16x128xf32>
    %cst_5 = arith.constant 0.000000e+00 : f32
    %6 = vector.broadcast %cst_5 : f32 to vector<16x128xf32>
    %7 = arith.maximumf %5, %6 : vector<16x128xf32>
    %8 = arith.truncf %7 : vector<16x128xf32> to vector<16x128xbf16>
    %c0_6 = arith.constant 0 : index
    %c0_7 = arith.constant 0 : index
    %9 = vector.load %arg4[%c0_6, %c0_7] : memref<128x128xbf16, #tpu.memory_space<vmem>>, vector<128x128xbf16>
    %c0_8 = arith.constant 0 : index
    %c0_9 = arith.constant 0 : index
    %10 = vector.load %arg5[%c0_8, %c0_9] : memref<1x128xf32, #tpu.memory_space<vmem>>, vector<1x128xf32>
    %cst_10 = arith.constant dense<0.000000e+00> : vector<16x128xf32>
    %11 = tpu.matmul %8, %9, %cst_10 {dimension_numbers = #tpu.dot_dimension_numbers<[1], [0], [0], [1], [0, 0, 1, 1], [], []>} : vector<16x128xbf16>, vector<128x128xbf16>, vector<16x128xf32> -> vector<16x128xf32>
    %12 = vector.broadcast %10 : vector<1x128xf32> to vector<16x128xf32>
    %13 = arith.addf %11, %12 : vector<16x128xf32>
    %cst_11 = arith.constant 0.000000e+00 : f32
    %14 = vector.broadcast %cst_11 : f32 to vector<16x128xf32>
    %15 = arith.maximumf %13, %14 : vector<16x128xf32>
    %16 = arith.truncf %15 : vector<16x128xf32> to vector<16x128xbf16>
    %c0_12 = arith.constant 0 : index
    %c0_13 = arith.constant 0 : index
    %17 = vector.load %arg6[%c0_12, %c0_13] : memref<128x128xbf16, #tpu.memory_space<vmem>>, vector<128x128xbf16>
    %c0_14 = arith.constant 0 : index
    %c0_15 = arith.constant 0 : index
    %18 = vector.load %arg7[%c0_14, %c0_15] : memref<1x128xf32, #tpu.memory_space<vmem>>, vector<1x128xf32>
    %cst_16 = arith.constant dense<0.000000e+00> : vector<16x128xf32>
    %19 = tpu.matmul %16, %17, %cst_16 {dimension_numbers = #tpu.dot_dimension_numbers<[1], [0], [0], [1], [0, 0, 1, 1], [], []>} : vector<16x128xbf16>, vector<128x128xbf16>, vector<16x128xf32> -> vector<16x128xf32>
    %20 = vector.broadcast %18 : vector<1x128xf32> to vector<16x128xf32>
    %21 = arith.addf %19, %20 : vector<16x128xf32>
    %cst_17 = arith.constant 0.000000e+00 : f32
    %22 = vector.broadcast %cst_17 : f32 to vector<16x128xf32>
    %23 = arith.maximumf %21, %22 : vector<16x128xf32>
    %c0_18 = arith.constant 0 : index
    %c0_19 = arith.constant 0 : index
    %24 = vector.load %arg8[%c0_18, %c0_19] : memref<16x128xf32, #tpu.memory_space<vmem>>, vector<16x128xf32>
    tpu.vector_store %arg8[%c0_18, %c0_19], %23 {strides = array<i32>} : memref<16x128xf32, #tpu.memory_space<vmem>>, vector<16x128xf32>,
    return
  }
  func.func @transform_0(%arg0: i32) -> (i32, i32) {
    %c0_i32 = arith.constant 0 : i32
    %c0_i32_0 = arith.constant 0 : i32
    return %arg0, %c0_i32 : i32, i32
  }
  func.func @transform_1(%arg0: i32) -> (i32, i32) {
    %c0_i32 = arith.constant 0 : i32
    %c0_i32_0 = arith.constant 0 : i32
    %c0_i32_1 = arith.constant 0 : i32
    return %c0_i32, %c0_i32_0 : i32, i32
  }
  func.func @transform_2(%arg0: i32) -> (i32, i32) {
    %c0_i32 = arith.constant 0 : i32
    %c0_i32_0 = arith.constant 0 : i32
    %c0_i32_1 = arith.constant 0 : i32
    return %c0_i32, %c0_i32_0 : i32, i32
  }
  func.func @transform_3(%arg0: i32) -> (i32, i32) {
    %c0_i32 = arith.constant 0 : i32
    %c0_i32_0 = arith.constant 0 : i32
    %c0_i32_1 = arith.constant 0 : i32
    return %c0_i32, %c0_i32_0 : i32, i32
  }
  func.func @transform_4(%arg0: i32) -> (i32, i32) {
    %c0_i32 = arith.constant 0 : i32
    %c0_i32_0 = arith.constant 0 : i32
    %c0_i32_1 = arith.constant 0 : i32
    return %c0_i32, %c0_i32_0 : i32, i32
  }
  func.func @transform_5(%arg0: i32) -> (i32, i32) {
    %c0_i32 = arith.constant 0 : i32
    %c0_i32_0 = arith.constant 0 : i32
    %c0_i32_1 = arith.constant 0 : i32
    return %c0_i32, %c0_i32_0 : i32, i32
  }
  func.func @transform_6(%arg0: i32) -> (i32, i32) {
    %c0_i32 = arith.constant 0 : i32
    %c0_i32_0 = arith.constant 0 : i32
    %c0_i32_1 = arith.constant 0 : i32
    return %c0_i32, %c0_i32_0 : i32, i32
  }
  func.func @transform_7(%arg0: i32) -> (i32, i32) {
    %c0_i32 = arith.constant 0 : i32
    %c0_i32_0 = arith.constant 0 : i32
    return %arg0, %c0_i32 : i32, i32
  }
}

</mosaic_0001>

<bundles_post_ra>
// kernel: tpu_custom_call.1
= control target key start
LH: loop header
LB: loop body
LE: loop exit
PB: predicated region body
PF: predicated region fallthrough
CT: control target
= control target key end

     0   :  { %12 = vsyncpa [#allocation3], 0  ;;  %s821_s0 = inlined_call_operand.hbm [shape: bf16[16,32], index: 0, kind: input, shape index: {}]   ;;  %s822_s1 = inlined_call_operand.hbm [shape: bf16[32,128], index: 1, kind: input, shape index: {}]   ;;  %s823_s2 = inlined_call_operand.vmem [shape: f32[1,128], index: 2, kind: input, shape index: {}]   ;;  %s824_s3 = inlined_call_operand.hbm [shape: bf16[128,128], index: 3, kind: input, shape index: {}]   ;;  %s825_s4 = inlined_call_operand.vmem [shape: f32[1,128], index: 4, kind: input, shape index: {}]   ;;  %s826_s5 = inlined_call_operand.hbm [shape: bf16[128,128], index: 5, kind: input, shape index: {}]   ;;  %s827_s6 = inlined_call_operand.vmem [shape: f32[1,128], index: 6, kind: input, shape index: {}]   ;;  %s828_s7 = inlined_call_operand.hbm [shape: f32[16,128], index: 7, kind: output, shape index: {}]  }
   0x1   :  { %13 = vsyncpa [#allocation6], 0 }
   0x2   :  { %14 = vsyncpa [#allocation9], 0 }
   0x3   :  { %15 = vsyncpa [#allocation4], 0  ;;  %s651_s24 = smov [#allocation5]   ;;  %s652_s26 = smov [#allocation2]  }
   0x4   :  { %s33_s25 = sshll.u32 %s651_s24, 4  ;;  %s21_s27 = sshll.u32 %s652_s26, 4  ;;  %s34_s25 = int_to_ptr.vmem [resolvable:$true] %s33_s25  ;;  %s702_s27 = int_to_ptr.vmem [resolvable:$true] %s21_s27 }
   0x5   :  { %s533_s30 = scalar_lea.hbm %s822_s1, 256 }
   0x6   :  { %p534_p0 = scmp.ne.s32.totalorder %s822_s1, %s533_s30  ;;  %p537_p1 = scmp.lt.u32.totalorder %s533_s30, %s822_s1 }
   0x8   :  { %p539_p2 = pnand %p537_p1, %p534_p0 }
   0xa   :  { %542 = shalt.err (!%p539_p2)
}
   0xb   :  { %s543_s12 = scalar_lea.vmem %s34_s25, 256  ;;  %p548_p4 = scmp.lt.s32.totalorder %s34_s25, %s34_s25 }
   0xc   :  { %p544_p3 = scmp.ne.s32.totalorder %s34_s25, %s543_s12  ;;  %p549_p5 = scmp.lt.s32.totalorder %s543_s12, %s543_s12 }
   0xe   :  { %p550_p6 = por %p549_p5, %p548_p4 }
  0x10   :  { %p551_p7 = pnand %p550_p6, %p544_p3 }
  0x12   :  { %554 = shalt.err (!%p551_p7)
}
  0x13   :  { %s653_s13 = smov 64   ;;  %s654_s14 = smov 4  }
  0x14   :  { %39 = dma.hbm_to_vmem [thread:$0]  %s822_s1, 256, %s34_s25, [#allocation6], %s653_s13, %s653_s13, %s654_s14  }
  0x15   :  { %s555_s19 = scalar_lea.hbm %s821_s0, 128 }
  0x16   :  { %p556_p8 = scmp.ne.s32.totalorder %s821_s0, %s555_s19  ;;  %p559_p9 = scmp.lt.u32.totalorder %s555_s19, %s821_s0 }
  0x18   :  { %p561_p10 = pnand %p559_p9, %p556_p8 }
  0x1a   :  { %564 = shalt.err (!%p561_p10)
}
  0x1b   :  { %s565_s24 = scalar_lea.vmem %s702_s27, 128  ;;  %p570_p12 = scmp.lt.s32.totalorder %s702_s27, %s702_s27 }
  0x1c   :  { %p566_p11 = scmp.ne.s32.totalorder %s702_s27, %s565_s24  ;;  %p571_p13 = scmp.lt.s32.totalorder %s565_s24, %s565_s24 }
  0x1e   :  { %p572_p0 = por %p571_p13, %p570_p12 }
  0x20   :  { %p573_p1 = pnand %p572_p0, %p566_p11 }
  0x22   :  { %576 = shalt.err (!%p573_p1)
}
  0x23   :  { %27 = dma.hbm_to_vmem [thread:$0]  %s821_s0, 128, %s702_s27, [#allocation3], %s653_s13, %s653_s13, %s654_s14  }
  0x24   :  { %s655_s26 = smov [#allocation7]   ;;  %s656_s29 = smov [#allocation8]  }
  0x25   :  { %s47_s28 = sshll.u32 %s655_s26, 4  ;;  %s61_s30 = sshll.u32 %s656_s29, 4  ;;  %s48_s28 = int_to_ptr.vmem [resolvable:$true] %s47_s28  ;;  %s739_s30 = int_to_ptr.vmem [resolvable:$true] %s61_s30 }
  0x26   :  { %s577_s10 = scalar_lea.hbm %s824_s3, 1024 }
  0x27   :  { %p578_p2 = scmp.ne.s32.totalorder %s824_s3, %s577_s10  ;;  %p581_p3 = scmp.lt.u32.totalorder %s577_s10, %s824_s3 }
  0x29   :  { %p583_p4 = pnand %p581_p3, %p578_p2 }
  0x2b   :  { %586 = shalt.err (!%p583_p4)
}
  0x2c   :  { %s587_s0 = scalar_lea.vmem %s48_s28, 1024  ;;  %p592_p6 = scmp.lt.s32.totalorder %s48_s28, %s48_s28 }
  0x2d   :  { %p588_p5 = scmp.ne.s32.totalorder %s48_s28, %s587_s0  ;;  %p593_p7 = scmp.lt.s32.totalorder %s587_s0, %s587_s0 }
  0x2f   :  { %p594_p8 = por %p593_p7, %p592_p6 }
  0x31   :  { %p595_p9 = pnand %p594_p8, %p588_p5 }
  0x33   :  { %598 = shalt.err (!%p595_p9)
}
  0x34   :  { %53 = dma.hbm_to_vmem [thread:$0]  %s824_s3, 1024, %s48_s28, [#allocation6], %s653_s13, %s653_s13, %s654_s14  }
  0x35   :  { %s599_s20 = scalar_lea.hbm %s826_s5, 1024 }
  0x36   :  { %p600_p10 = scmp.ne.s32.totalorder %s826_s5, %s599_s20  ;;  %p603_p11 = scmp.lt.u32.totalorder %s599_s20, %s826_s5 }
  0x38   :  { %p605_p12 = pnand %p603_p11, %p600_p10 }
  0x3a   :  { %608 = shalt.err (!%p605_p12)
}
  0x3b   :  { %s609_s1 = scalar_lea.vmem %s739_s30, 1024  ;;  %p614_p0 = scmp.lt.s32.totalorder %s739_s30, %s739_s30 }
  0x3c   :  { %p610_p13 = scmp.ne.s32.totalorder %s739_s30, %s609_s1  ;;  %p615_p1 = scmp.lt.s32.totalorder %s609_s1, %s609_s1 }
  0x3e   :  { %p616_p2 = por %p615_p1, %p614_p0 }
  0x40   :  { %p617_p3 = pnand %p616_p2, %p610_p13 }
  0x42   :  { %620 = shalt.err (!%p617_p3)
}
  0x43   :  { %67 = dma.hbm_to_vmem [thread:$0]  %s826_s5, 1024, %s739_s30, [#allocation9], %s653_s13, %s653_s13, %s654_s14  }
  0x44   :  { %643 = dma.done.wait [#allocation3], 128  }
  0x45   :  { %644 = vsyncadd [#allocation3], 4294967168 }
  0x46   :  { %645 = dma.done.wait [#allocation6], 1280  }
  0x47   :  { %646 = vsyncadd [#allocation6], 4294966016 }
  0x48   :  { %647 = dma.done.wait [#allocation9], 1024  }
  0x49   :  { %648 = vsyncadd [#allocation9], 4294966272  ;;  %v657_v0 = vmov 0.0   ;;  %vm658_vm0 = vmmov 0   ;;  %v514_v1 = vld [vmem:[#allocation5] sm:$0xff]   ;;  %v515_v2 = vld [vmem:[#allocation5 + $0x8] sm:$0xff]  }
  0x4a   :  { %455 = vmatprep.subr.bf16.mxu0 %v657_v0  ;;  %459 = vmatprep.mubr.msk.bf16.mxu0 %vm658_vm0, %v657_v0  ;;  %v517_v3 = vld [vmem:[#allocation7] sm:$0xff]   ;;  %v516_v4 = vld [vmem:[#allocation2] sm:$0xff]   ;;  %vm113_vm1 = vcmask 261120   ;;  %v519_v6 = vld [vmem:[#allocation7 + $0x10] sm:$0xff]   ;;  %s659_s29 = smov [#allocation10]  }
  0x4b   :  { %463 = vmatprep.subr.bf16.mxu1 %v657_v0  ;;  %479 = vmatprep.mubr.msk.bf16.mxu1 %vm658_vm0, %v657_v0  ;;  %v518_v5 = vld [vmem:[#allocation7 + $0x8] sm:$0xff]   ;;  %v520_v7 = vld [vmem:[#allocation7 + $0x18] sm:$0xff]   ;;  %v521_v8 = vld [vmem:[#allocation7 + $0x20] sm:$0xff]   ;;  %s397_s30 = sshll.u32 %s659_s29, 4  ;;  %s398_s30 = int_to_ptr.vmem [resolvable:$true] %s397_s30 }
  0x4c   :  { %456 = vmatpush3.bf16.msra.mxu0 %v514_v1  ;;  %464 = vmatpush3.bf16.msra.mxu1 %v517_v3  ;;  %v522_v9 = vld [vmem:[#allocation7 + $0x28] sm:$0xff]   ;;  %v523_v10 = vld [vmem:[#allocation7 + $0x30] sm:$0xff]   ;;  %v524_v11 = vld [vmem:[#allocation7 + $0x38] sm:$0xff]   ;;  %p626_p5 = scmp.lt.s32.totalorder %s398_s30, %s398_s30 }
  0x4d   :  { %457 = vmatprep.subr.bf16.mxu0 %v657_v0  ;;  %465 = vmatprep.subr.bf16.mxu1 %v657_v0  ;;  %v525_v12 = vld [vmem:[#allocation8] sm:$0xff]   ;;  %v526_v13 = vld [vmem:[#allocation8 + $0x8] sm:$0xff]   ;;  %v527_v14 = vld [vmem:[#allocation8 + $0x10] sm:$0xff]  }
  0x4e   :  { %v528_v15 = vld [vmem:[#allocation8 + $0x18] sm:$0xff]   ;;  %v529_v16 = vld [vmem:[#allocation8 + $0x20] sm:$0xff]   ;;  %v530_v17 = vld [vmem:[#allocation8 + $0x28] sm:$0xff]  }
  0x4f   :  { %v411_v18 = vld [vmem:[%s823_s2] ss:$0 sm:$0xff]  ;;  %v531_v28 = vld [vmem:[#allocation8 + $0x30] sm:$0xff]   ;;  %v532_v29 = vld [vmem:[#allocation8 + $0x38] sm:$0xff]  }
  0x50   :  { %458 = vmatpush3.bf16.msra.mxu0 %v515_v2  ;;  %466 = vmatpush3.bf16.msra.mxu1 %v518_v5  ;;  %v416_v30 = vld [vmem:[%s825_s4] ss:$0 sm:$0xff]  ;;  %s621_s4 = scalar_lea.vmem %s398_s30, 256 }
  0x51   :  { %483 = vmatprep.subr.bf16.mxu0 %v657_v0  ;;  %467 = vmatprep.subr.bf16.mxu1 %v657_v0  ;;  %v425_v40 = vld [vmem:[%s827_s6] ss:$0 sm:$0xff]  ;;  %p622_p4 = scmp.ne.s32.totalorder %s398_s30, %s621_s4  ;;  %p627_p6 = scmp.lt.s32.totalorder %s621_s4, %s621_s4 }
  0x53   :  { %460 = vmatmul.mubr.msk.bf16.vlgmr.msra.gmra.mrb[0].mxu0 %vm113_vm1, %v516_v4  ;;  %p628_p7 = por %p627_p6, %p626_p5 }
  0x54   :  { %499 = vmatprep.mubr.msk.bf16.mxu0 %vm658_vm0, %v657_v0  ;;  %468 = vmatpush3.bf16.msra.mxu1 %v519_v6 }
  0x55   :  { %469 = vmatprep.subr.bf16.mxu1 %v657_v0  ;;  %484 = vmatpush3.bf16.msra.mxu0 %v525_v12  ;;  %p629_p8 = pnand %p628_p7, %p622_p4 }
  0x56   :  { %485 = vmatprep.subr.bf16.mxu0 %v657_v0 }
  0x58   :  { %470 = vmatpush3.bf16.msra.mxu1 %v520_v7 }
  0x59   :  { %471 = vmatprep.subr.bf16.mxu1 %v657_v0  ;;  %486 = vmatpush3.bf16.msra.mxu0 %v526_v13 }
  0x5a   :  { %487 = vmatprep.subr.bf16.mxu0 %v657_v0 }
  0x5c   :  { %472 = vmatpush3.bf16.msra.mxu1 %v521_v8 }
  0x5d   :  { %473 = vmatprep.subr.bf16.mxu1 %v657_v0  ;;  %488 = vmatpush3.bf16.msra.mxu0 %v527_v14 }
  0x5e   :  { %489 = vmatprep.subr.bf16.mxu0 %v657_v0 }
  0x60   :  { %474 = vmatpush3.bf16.msra.mxu1 %v522_v9 }
  0x61   :  { %475 = vmatprep.subr.bf16.mxu1 %v657_v0  ;;  %490 = vmatpush3.bf16.msra.mxu0 %v528_v15 }
  0x62   :  { %491 = vmatprep.subr.bf16.mxu0 %v657_v0 }
  0x64   :  { %476 = vmatpush3.bf16.msra.mxu1 %v523_v10 }
  0x65   :  { %477 = vmatprep.subr.bf16.mxu1 %v657_v0  ;;  %492 = vmatpush3.bf16.msra.mxu0 %v529_v16 }
  0x66   :  { %493 = vmatprep.subr.bf16.mxu0 %v657_v0 }
  0x68   :  { %478 = vmatpush3.bf16.msra.mxu1 %v524_v11 }
  0x69   :  { %494 = vmatpush3.bf16.msra.mxu0 %v530_v17 }
  0x6a   :  { %495 = vmatprep.subr.bf16.mxu0 %v657_v0 }
  0x6d   :  { %496 = vmatpush3.bf16.msra.mxu0 %v531_v28 }
  0x6e   :  { %497 = vmatprep.subr.bf16.mxu0 %v657_v0 }
  0x71   :  { %498 = vmatpush3.bf16.msra.mxu0 %v532_v29 }
 0x126   :  { %v151_v19 = vpop.f32.mrb[0].mxu0 }
 0x127   :  { %v152_v20 = vadd.f32 %v411_v18, %v151_v19  ;;  %v461_v21 = vpop.f32.mrb[1].mxu0 }
 0x128   :  { %v154_v22 = vpop.f32.mrb[2].mxu0 }
 0x129   :  { %v155_v23 = vadd.f32 %v411_v18, %v154_v22  ;;  %v462_v24 = vpop.f32.mrb[3].mxu0  ;;  %v158_v25 = vmax.f32 %v152_v20, 0.0 }
 0x12b   :  { %v159_v26 = vmax.f32 %v155_v23, 0.0 }
 0x12d   :  { %v160_v27 = vpack.c.bf16 %v159_v26, %v158_v25 }
 0x12f   :  { %480 = vmatmul.mubr.bf16.vlgmr.msra.gmra.mrb[0].mxu1 %v160_v27 }
 0x202   :  { %v266_v31 = vpop.f32.mrb[0].mxu1 }
 0x203   :  { %v267_v32 = vadd.f32 %v416_v30, %v266_v31  ;;  %v481_v33 = vpop.f32.mrb[1].mxu1 }
 0x204   :  { %v269_v34 = vpop.f32.mrb[2].mxu1 }
 0x205   :  { %v270_v35 = vadd.f32 %v416_v30, %v269_v34  ;;  %v482_v36 = vpop.f32.mrb[3].mxu1  ;;  %v273_v37 = vmax.f32 %v267_v32, 0.0 }
 0x207   :  { %v274_v38 = vmax.f32 %v270_v35, 0.0 }
 0x209   :  { %v275_v39 = vpack.c.bf16 %v274_v38, %v273_v37 }
 0x20b   :  { %500 = vmatmul.mubr.bf16.vlgmr.msra.gmra.mrb[4].mxu0 %v275_v39 }
 0x2de   :  { %v381_v41 = vpop.f32.mrb[4].mxu0 }
 0x2df   :  { %v382_v42 = vadd.f32 %v425_v40, %v381_v41  ;;  %v501_v43 = vpop.f32.mrb[5].mxu0 }
 0x2e0   :  { %v384_v44 = vpop.f32.mrb[6].mxu0 }
 0x2e1   :  { %v388_v45 = vmax.f32 %v382_v42, 0.0  ;;  %v385_v46 = vadd.f32 %v425_v40, %v384_v44  ;;  %v502_v47 = vpop.f32.mrb[7].mxu0 }
 0x2e3   :  { %390 = vst [vmem:[#allocation10] sm:$0xff] %v388_v45  ;;  %v389_v48 = vmax.f32 %v385_v46, 0.0 }
 0x2e5   :  { %391 = vst [vmem:[#allocation10 + $0x8] sm:$0xff] %v389_v48 }
 0x2e6   :  { %632 = shalt.err (!%p629_p8)
}
 0x2e7   :  { %s633_s9 = scalar_lea.hbm %s828_s7, 256 }
 0x2e8   :  { %p634_p9 = scmp.ne.s32.totalorder %s828_s7, %s633_s9  ;;  %p637_p10 = scmp.lt.u32.totalorder %s633_s9, %s828_s7 }
 0x2ea   :  { %p639_p11 = pnand %p637_p10, %p634_p9 }
 0x2ec   :  { %642 = shalt.err (!%p639_p11)
}
 0x2ed   :  { %s660_s16 = smov 128   ;;  %s661_s0 = smov 8  }
 0x2ee   :  { %403 = dma.vmem_to_hbm [thread:$0]  %s398_s30, 256, %s828_s7, [#allocation4], %s660_s16, %s660_s16, %s661_s0  }
 0x2ef   :  { %649 = dma.done.wait [#allocation4], 256  }
 0x2f0   :  { %650 = vsyncadd [#allocation4], 4294967040 }
 0x2f1   :  { %407 = vsyncpa [#allocation3], 1 }
 0x2f2   :  { %408 = vsyncpa [#allocation6], 1 }
 0x2f3   :  { %409 = vsyncpa [#allocation9], 1 }
 0x2f4   :  { %410 = vsyncpa [#allocation4], 1 }

</bundles_post_ra>
